<compile_context>
chip_gen: v6e
topology: v6e:2x2x1
jax: 0.10.0
libtpu: 0.0.40
codegen_flags: <defaults>
</compile_context>

<pallas_src>
import jax
import jax.numpy as jnp
from jax.experimental import pallas as pl
from jax.experimental.pallas import tpu as pltpu


def pos_embedding_kernel(row_ref, out_ref):
    """Broadcast a (1, tc) slab of the positional table over a (tb, tc) tile."""
    out_ref[...] = jnp.broadcast_to(row_ref[...], out_ref.shape)


def _choose_tiles(B, P, itemsize, *, target_tile_bytes, vmem_budget):
    """Pick (tb, tc): batch rows and flattened columns per grid step.

    Guarantees 2*tb*tc*itemsize (double-buffered output) + 2*tc*itemsize
    (input slab, conservatively double-buffered) <= vmem_budget.
    """
    # Smallest batch tile we may be forced to use: a sub-full batch block must
    # be a multiple of 8 sublanes ((8,128) rule), so if B <= 8 we use B.
    min_tb = B if B <= 8 else 8
    # Largest column tile that keeps even the minimal batch tile in budget.
    denom = itemsize * (2 * min_tb + 2)
    tc_max = max(128, (vmem_budget // denom) // 128 * 128)
    if P <= tc_max:
        tc = P                                   # whole slab per step (full-extent block)
    else:
        # ~1 MiB column tiles (multiple of 128 lanes); last tile may be partial.
        tc_target = max(128, ((1 << 20) // itemsize) // 128 * 128)
        tc = min(tc_max, tc_target)

    tile_bytes = tc * itemsize
    tb_budget = max(1, (vmem_budget - 2 * tile_bytes) // (2 * tile_bytes))
    tb = min(B, tb_budget, max(1, target_tile_bytes // tile_bytes))
    if tb >= B:
        tb = B
    else:
        tb = max(8, (tb // 8) * 8)               # sub-full batch block: multiple of 8
        if tb >= B:
            tb = B
    return tb, tc


def position_wise_embedding(x, table, *, target_tile_bytes=4 << 20,
                            vmem_budget_bytes=24 << 20, out_dtype=None):
    """x: (B, L) int token ids (values unused); table: (max_len, D)."""
    B, L = x.shape
    max_len, D = table.shape
    if L > max_len:
        # VMEM refs have no runtime bounds check; fail loudly at trace time.
        raise ValueError(f"sequence length {L} exceeds max_len {max_len}")

    out_dtype = table.dtype if out_dtype is None else jnp.dtype(out_dtype)
    itemsize = jnp.dtype(out_dtype).itemsize
    P = L * D
    # Lane-dense slab of only the rows actually used: (1, L*D).  Tiny XLA op
    # (layout plumbing, not compute).
    row = table[:L].astype(out_dtype).reshape(1, P)

    tb, tc = _choose_tiles(B, P, itemsize,
                           target_tile_bytes=target_tile_bytes,
                           vmem_budget=vmem_budget_bytes)
    num_b = pl.cdiv(B, tb)
    num_c = pl.cdiv(P, tc)
    # Column axis outer, batch axis inner -> the input block index is constant
    # across the inner loop and only changes num_c times.
    grid = (num_c, num_b)

    # VMEM actually needed (output double-buffered + input slab, conservatively
    # double-buffered) + headroom for internal scratch, capped at the scoped max.
    needed = 2 * tb * tc * itemsize + 2 * tc * itemsize
    vmem_limit = int(min(32 << 20, needed + (4 << 20)))

    def _run(in_pipeline_mode):
        if in_pipeline_mode is None:
            in_spec = pl.BlockSpec((1, tc), lambda c, b: (0, c))
        else:
            in_spec = pl.BlockSpec((1, tc), lambda c, b: (0, c),
                                   pipeline_mode=in_pipeline_mode)
        return pl.pallas_call(
            pos_embedding_kernel,
            out_shape=jax.ShapeDtypeStruct((B, P), out_dtype),
            grid_spec=pltpu.PrefetchScalarGridSpec(
                num_scalar_prefetch=0,
                grid=grid,
                in_specs=[in_spec],
                out_specs=pl.BlockSpec((tb, tc), lambda c, b: (b, c)),
            ),
            compiler_params=pltpu.CompilerParams(
                # All tiles are independent -> megacore-shardable (v7x 2 TCs);
                # near-neutral on single-TC v5e/v6e.
                dimension_semantics=("parallel", "parallel"),
                vmem_limit_bytes=vmem_limit,
            ),
            cost_estimate=pl.CostEstimate(
                flops=0,
                transcendentals=0,
                bytes_accessed=B * P * itemsize + P * itemsize,
            ),
        )(row)

    if num_c == 1:
        # Input index map is constant across the whole grid -> single-buffer
        # the slab (frees the dead second buffer).  Fall back gracefully if
        # this JAX build rejects buffer_count=1.
        try:
            out2d = _run(pl.Buffered(1))
        except Exception:
            out2d = _run(None)
    else:
        out2d = _run(None)

    return out2d.reshape(B, L, D)


if __name__ == "__main__":
    # Module hyper-params (small, consistent with __init__ signature)
    vocab_size, embedding_dim, max_len = 20, 32, 16
    B, L = 2, 8  # batch, sequence length (L <= max_len)

    key = jax.random.PRNGKey(0)
    k_tab, k_x = jax.random.split(key)

    # nn.Embedding default init: weight ~ N(0, 1)
    pos_table = jax.random.normal(k_tab, (max_len, embedding_dim), dtype=jnp.float32)
    # token-id input (values are irrelevant to the forward pass)
    x = jax.random.randint(k_x, (B, L), 0, vocab_size, dtype=jnp.int32)

    out = position_wise_embedding(x, pos_table)
    out = jax.block_until_ready(out)

    # Reference: pos_embedding(arange(L)) broadcast over batch
    ref = jnp.broadcast_to(pos_table[:L][None, :, :], (B, L, embedding_dim))
    assert out.shape == (B, L, embedding_dim), out.shape
    assert out.dtype == jnp.float32
    assert jnp.allclose(out, ref), "mismatch vs reference"
    print("KERNEL_OK")
</pallas_src>

<mosaic_0001>
module attributes {stable_mosaic.version = 11 : i64} {
  func.func @pos_embedding_kernel(%arg0: i32, %arg1: i32, %arg2: memref<1x256xf32, #tpu.memory_space<vmem>>, %arg3: memref<2x256xf32, #tpu.memory_space<vmem>>) attributes {dimension_semantics = [#tpu.dimension_semantics<parallel>, #tpu.dimension_semantics<parallel>], iteration_bounds = array<i64: 1, 1>, scalar_prefetch = 0 : i64, scratch_operands = 0 : i64, tpu.core_type = #tpu.core_type<tc>, window_params = [{pipeline_mode = #tpu.pipeline_mode<synchronous>, transform_indices = @transform_0, window_bounds = array<i64: 1, 256>}, {transform_indices = @transform_1, window_bounds = array<i64: 2, 256>}]} {
    %c0 = arith.constant 0 : index
    %c0_0 = arith.constant 0 : index
    %0 = vector.load %arg2[%c0, %c0_0] : memref<1x256xf32, #tpu.memory_space<vmem>>, vector<1x256xf32>
    %1 = vector.shape_cast %0 : vector<1x256xf32> to vector<1x256xf32>
    %2 = vector.broadcast %1 : vector<1x256xf32> to vector<2x256xf32>
    %c0_1 = arith.constant 0 : index
    %c0_2 = arith.constant 0 : index
    %3 = vector.load %arg3[%c0_1, %c0_2] : memref<2x256xf32, #tpu.memory_space<vmem>>, vector<2x256xf32>
    tpu.vector_store %arg3[%c0_1, %c0_2], %2 {strides = array<i32>} : memref<2x256xf32, #tpu.memory_space<vmem>>, vector<2x256xf32>,
    return
  }
  func.func @transform_0(%arg0: i32, %arg1: i32) -> (i32, i32) {
    %c0_i32 = arith.constant 0 : i32
    %c0_i32_0 = arith.constant 0 : i32
    return %c0_i32, %arg0 : i32, i32
  }
  func.func @transform_1(%arg0: i32, %arg1: i32) -> (i32, i32) {
    %c0_i32 = arith.constant 0 : i32
    return %arg1, %arg0 : i32, i32
  }
}

module attributes {stable_mosaic.version = 11 : i64} {
  func.func @pos_embedding_kernel(%arg0: i32, %arg1: i32, %arg2: memref<1x256xf32, #tpu.memory_space<vmem>>, %arg3: memref<2x256xf32, #tpu.memory_space<vmem>>) attributes {dimension_semantics = [#tpu.dimension_semantics<parallel>, #tpu.dimension_semantics<parallel>], iteration_bounds = array<i64: 1, 1>, scalar_prefetch = 0 : i64, scratch_operands = 0 : i64, tpu.core_type = #tpu.core_type<tc>, window_params = [{transform_indices = @transform_0, window_bounds = array<i64: 1, 256>}, {transform_indices = @transform_1, window_bounds = array<i64: 2, 256>}]} {
    %c0 = arith.constant 0 : index
    %c0_0 = arith.constant 0 : index
    %0 = vector.load %arg2[%c0, %c0_0] : memref<1x256xf32, #tpu.memory_space<vmem>>, vector<1x256xf32>
    %1 = vector.shape_cast %0 : vector<1x256xf32> to vector<1x256xf32>
    %2 = vector.broadcast %1 : vector<1x256xf32> to vector<2x256xf32>
    %c0_1 = arith.constant 0 : index
    %c0_2 = arith.constant 0 : index
    %3 = vector.load %arg3[%c0_1, %c0_2] : memref<2x256xf32, #tpu.memory_space<vmem>>, vector<2x256xf32>
    tpu.vector_store %arg3[%c0_1, %c0_2], %2 {strides = array<i32>} : memref<2x256xf32, #tpu.memory_space<vmem>>, vector<2x256xf32>,
    return
  }
  func.func @transform_0(%arg0: i32, %arg1: i32) -> (i32, i32) {
    %c0_i32 = arith.constant 0 : i32
    %c0_i32_0 = arith.constant 0 : i32
    return %c0_i32, %arg0 : i32, i32
  }
  func.func @transform_1(%arg0: i32, %arg1: i32) -> (i32, i32) {
    %c0_i32 = arith.constant 0 : i32
    return %arg1, %arg0 : i32, i32
  }
}

</mosaic_0001>

<bundles_post_ra>
// kernel: tpu_custom_call.1
= control target key start
LH: loop header
LB: loop body
LE: loop exit
PB: predicated region body
PF: predicated region fallthrough
CT: control target
= control target key end

     0   :  { %6 = vsyncpa [#allocation3], 0  ;;  %s121_s0 = inlined_call_operand.hbm [shape: f32[1,256], index: 0, kind: input, shape index: {}]   ;;  %s122_s1 = inlined_call_operand.hbm [shape: f32[2,256], index: 1, kind: output, shape index: {}]  }
   0x1   :  { %7 = vsyncpa [#allocation4], 0  ;;  %s103_s6 = smov [#allocation2]  }
   0x2   :  { %s14_s7 = sshll.u32 %s103_s6, 4  ;;  %s15_s7 = int_to_ptr.vmem [resolvable:$true] %s14_s7 }
   0x3   :  { %s67_s8 = scalar_lea.vmem %s15_s7, 32  ;;  %p72_p1 = scmp.lt.s32.totalorder %s15_s7, %s15_s7 }
   0x4   :  { %p68_p0 = scmp.ne.s32.totalorder %s15_s7, %s67_s8  ;;  %p73_p2 = scmp.lt.s32.totalorder %s67_s8, %s67_s8 }
   0x6   :  { %p74_p3 = por %p73_p2, %p72_p1 }
   0x8   :  { %p75_p4 = pnand %p74_p3, %p68_p0 }
   0xa   :  { %78 = shalt.err (!%p75_p4)
}
   0xb   :  { %17 = dma.hbm_to_vmem [thread:$0]  %s121_s0, 32, %s15_s7, [#allocation3]  }
   0xc   :  { %99 = dma.done.wait [#allocation3], 32  }
   0xd   :  { %100 = vsyncadd [#allocation3], 4294967264  ;;  %v23_v0 = vlaneseq  ;;  %v21_v4 = vld [vmem:[#allocation2] sm:$0x3]  ;;  %s104_s11 = smov [#allocation5]  }
   0xe   :  { %s47_s12 = sshll.u32 %s104_s11, 4  ;;  %s48_s12 = int_to_ptr.vmem [resolvable:$true] %s47_s12 }
   0xf   :  { %v24_v1 = vshrl.u32 %v23_v0, 7  ;;  %s79_s13 = scalar_lea.vmem %s48_s12, 64  ;;  %p84_p6 = scmp.lt.s32.totalorder %s48_s12, %s48_s12 }
  0x10   :  { %p80_p5 = scmp.ne.s32.totalorder %s48_s12, %s79_s13  ;;  %p85_p7 = scmp.lt.s32.totalorder %s79_s13, %s79_s13 }
  0x11   :  { %v25_v2 = vsub.s32 0, %v24_v1  ;;  %v29_v3 = vsub.s32 1, %v24_v1 }
  0x12   :  { %p86_p8 = por %p85_p7, %p84_p6 }
  0x13   :  { %v26_v5 = vrot.slane %v21_v4, %v25_v2  ;;  %v30_v6 = vrot.slane %v21_v4, %v29_v3 }
  0x14   :  { %p87_p9 = pnand %p86_p8, %p80_p5 }
  0x15   :  { %v31_v7 = vcombine.low %v26_v5, %v30_v6 }
  0x17   :  { %56 = vst.sshfl [vmem:[#allocation5] sm:$0x33 pattern:$0x76325410] %v31_v7 }
  0x18   :  { %90 = shalt.err (!%p87_p9)
}
  0x19   :  { %50 = dma.vmem_to_hbm [thread:$0]  %s48_s12, 64, %s122_s1, [#allocation4]  }
  0x1a   :  { %101 = dma.done.wait [#allocation4], 64  }
  0x1b   :  { %102 = vsyncadd [#allocation4], 4294967232 }
  0x1c   :  { %54 = vsyncpa [#allocation3], 1 }
  0x1d   :  { %55 = vsyncpa [#allocation4], 1 }

// kernel: tpu_custom_call.1
= control target key start
LH: loop header
LB: loop body
LE: loop exit
PB: predicated region body
PF: predicated region fallthrough
CT: control target
= control target key end

     0   :  { %6 = vsyncpa [#allocation3], 0  ;;  %s121_s0 = inlined_call_operand.hbm [shape: f32[1,256], index: 0, kind: input, shape index: {}]   ;;  %s122_s1 = inlined_call_operand.hbm [shape: f32[2,256], index: 1, kind: output, shape index: {}]  }
   0x1   :  { %7 = vsyncpa [#allocation4], 0  ;;  %s103_s6 = smov [#allocation2]  }
   0x2   :  { %s14_s7 = sshll.u32 %s103_s6, 4  ;;  %s15_s7 = int_to_ptr.vmem [resolvable:$true] %s14_s7 }
   0x3   :  { %s67_s8 = scalar_lea.vmem %s15_s7, 32  ;;  %p72_p1 = scmp.lt.s32.totalorder %s15_s7, %s15_s7 }
   0x4   :  { %p68_p0 = scmp.ne.s32.totalorder %s15_s7, %s67_s8  ;;  %p73_p2 = scmp.lt.s32.totalorder %s67_s8, %s67_s8 }
   0x6   :  { %p74_p3 = por %p73_p2, %p72_p1 }
   0x8   :  { %p75_p4 = pnand %p74_p3, %p68_p0 }
   0xa   :  { %78 = shalt.err (!%p75_p4)
}
   0xb   :  { %17 = dma.hbm_to_vmem [thread:$0]  %s121_s0, 32, %s15_s7, [#allocation3]  }
   0xc   :  { %99 = dma.done.wait [#allocation3], 32  }
   0xd   :  { %100 = vsyncadd [#allocation3], 4294967264  ;;  %v23_v0 = vlaneseq  ;;  %v21_v4 = vld [vmem:[#allocation2] sm:$0x3]  ;;  %s104_s11 = smov [#allocation5]  }
   0xe   :  { %s47_s12 = sshll.u32 %s104_s11, 4  ;;  %s48_s12 = int_to_ptr.vmem [resolvable:$true] %s47_s12 }
   0xf   :  { %v24_v1 = vshrl.u32 %v23_v0, 7  ;;  %s79_s13 = scalar_lea.vmem %s48_s12, 64  ;;  %p84_p6 = scmp.lt.s32.totalorder %s48_s12, %s48_s12 }
  0x10   :  { %p80_p5 = scmp.ne.s32.totalorder %s48_s12, %s79_s13  ;;  %p85_p7 = scmp.lt.s32.totalorder %s79_s13, %s79_s13 }
  0x11   :  { %v25_v2 = vsub.s32 0, %v24_v1  ;;  %v29_v3 = vsub.s32 1, %v24_v1 }
  0x12   :  { %p86_p8 = por %p85_p7, %p84_p6 }
  0x13   :  { %v26_v5 = vrot.slane %v21_v4, %v25_v2  ;;  %v30_v6 = vrot.slane %v21_v4, %v29_v3 }
  0x14   :  { %p87_p9 = pnand %p86_p8, %p80_p5 }
  0x15   :  { %v31_v7 = vcombine.low %v26_v5, %v30_v6 }
  0x17   :  { %56 = vst.sshfl [vmem:[#allocation5] sm:$0x33 pattern:$0x76325410] %v31_v7 }
  0x18   :  { %90 = shalt.err (!%p87_p9)
}
  0x19   :  { %50 = dma.vmem_to_hbm [thread:$0]  %s48_s12, 64, %s122_s1, [#allocation4]  }
  0x1a   :  { %101 = dma.done.wait [#allocation4], 64  }
  0x1b   :  { %102 = vsyncadd [#allocation4], 4294967232 }
  0x1c   :  { %54 = vsyncpa [#allocation3], 1 }
  0x1d   :  { %55 = vsyncpa [#allocation4], 1 }

</bundles_post_ra>
